<compile_context>
chip_gen: v7x
topology: tpu7x:2x2x1
jax: 0.10.0
libtpu: 0.0.40
codegen_flags: <defaults>
</compile_context>

<pallas_src>
import functools

import jax
import jax.numpy as jnp
from jax import lax
from jax.experimental import pallas as pl
from jax.experimental.pallas import tpu as pltpu


def _mlp_fused_gather_kernel(col_ref, row_ref, emb_ref, w1a_ref, w1b_ref,
                             b1_ref, w2_ref, b2_ref, w3t_ref, b3_ref, o_ref):
    """Gather emb rows in-kernel, then run the 3-stage MLP on a row tile."""
    emb = emb_ref[...]                         # (N, H) bf16, resident across grid
    col = col_ref[0, 0, :]                     # (TE,) int32
    row = row_ref[0, 0, :]
    f1 = jnp.take(emb, col, axis=0)            # (TE, H) dynamic row gather
    f2 = jnp.take(emb, row, axis=0)

    # concat([f1, f2], -1) @ W1 == f1 @ W1[:H] + f2 @ W1[H:]; the (TE, 2H)
    # concat is never materialized.  MXU bf16 operands, f32 accumulate.
    h1 = jnp.dot(f1, w1a_ref[...], preferred_element_type=jnp.float32)
    h1 = h1 + jnp.dot(f2, w1b_ref[...], preferred_element_type=jnp.float32)
    h1 = jnp.maximum(h1 + b1_ref[...], 0.0)                        # (TE, 4H) f32

    h2 = jnp.dot(h1.astype(w2_ref.dtype), w2_ref[...],
                 preferred_element_type=jnp.float32)
    h2 = jnp.maximum(h2 + b2_ref[...], 0.0)                        # (TE, H) f32

    # Stage 3: Linear(H -> 1) as (1,H) . (TE,H)^T so the result is a lane-dense
    # (1, TE) row feeding an unmasked full-width store.  bf16 operands.
    out = lax.dot_general(w3t_ref[...], h2.astype(w3t_ref.dtype),
                          dimension_numbers=(((1,), (1,)), ((), ())),
                          preferred_element_type=jnp.float32)      # (1, TE)
    out = out + b3_ref[0, 0]                                       # SMEM scalar
    o_ref[...] = out.reshape(o_ref.shape).astype(o_ref.dtype)      # (1, 1, TE)


def _mlp_kernel(x_ref, w1_ref, b1_ref, w2_ref, b2_ref, w3t_ref, b3_ref, o_ref):
    """Fallback: MLP on a pre-gathered (TE, 2H) edge-feature tile."""
    x = x_ref[...]                                                  # (TE, 2H) bf16
    h1 = jnp.dot(x, w1_ref[...], preferred_element_type=jnp.float32)
    h1 = jnp.maximum(h1 + b1_ref[...], 0.0)
    h2 = jnp.dot(h1.astype(w2_ref.dtype), w2_ref[...],
                 preferred_element_type=jnp.float32)
    h2 = jnp.maximum(h2 + b2_ref[...], 0.0)
    out = lax.dot_general(w3t_ref[...], h2.astype(w3t_ref.dtype),
                          dimension_numbers=(((1,), (1,)), ((), ())),
                          preferred_element_type=jnp.float32)
    out = out + b3_ref[0, 0]
    o_ref[...] = out.reshape(o_ref.shape).astype(o_ref.dtype)


def _pick_tile_e(num_edges, tile_e):
    """Cap the row tile so the 1-D grid keeps >= 2 steps when E allows (v7x has
    two TensorCores sharing the 'parallel' axis); keep it a multiple of 128."""
    tile_e = ((int(tile_e) + 127) // 128) * 128
    half = -(-num_edges // 2)
    half = ((half + 127) // 128) * 128
    return int(max(128, min(tile_e, half)))


@functools.partial(jax.jit, static_argnames=("tile_e", "fuse_gather"))
def extractor_mlp_forward(emb, edge_index, params, *, tile_e=1024,
                          fuse_gather=None):
    """Pallas forward of ExtractorMLP (learn_edge_att=True, eval mode)."""
    w1, b1, w2, b2, w3, b3 = params
    col, row = edge_index[0], edge_index[1]

    E = col.shape[0]
    N, H = emb.shape
    F_in, H4 = w1.shape                  # 2H, 4H
    Hm = w2.shape[1]                     # H

    compute_dtype = jnp.bfloat16
    emb_bytes = N * H * 2                # bf16-resident emb footprint

    if fuse_gather is None:
        # Keep emb resident in VMEM only when it comfortably fits (v7x has just
        # 64 MiB physical VMEM; leave headroom for tiles + intermediates).
        fuse_gather = emb_bytes <= 8 * 1024 * 1024

    tile = _pick_tile_e(E, tile_e)
    num_tiles = pl.cdiv(E, tile)
    E_pad = num_tiles * tile
    pad = E_pad - E

    # Pad the (cheap) index vectors rather than any gathered feature matrix.
    col_p = jnp.pad(col.astype(jnp.int32), (0, pad))
    row_p = jnp.pad(row.astype(jnp.int32), (0, pad))

    b1f = b1.reshape(1, H4).astype(jnp.float32)
    b2f = b2.reshape(1, Hm).astype(jnp.float32)
    w3t = w3.reshape(1, Hm).astype(compute_dtype)        # (1, H) bf16 row
    b3f = b3.reshape(1, 1).astype(jnp.float32)           # SMEM scalar

    weight_bytes = (F_in * H4 + H4 * Hm + Hm) * 2 + (H4 + Hm + 1) * 4
    flops = 2 * E_pad * (F_in * H4 + H4 * Hm + Hm)

    # Shared constant-parameter specs (weights resident across the grid).
    const_specs = [
        pl.BlockSpec((1, H4), lambda i: (0, 0)),             # b1 (f32)
        pl.BlockSpec((H4, Hm), lambda i: (0, 0)),            # W2 (bf16)
        pl.BlockSpec((1, Hm), lambda i: (0, 0)),             # b2 (f32)
        pl.BlockSpec((1, Hm), lambda i: (0, 0)),             # W3^T row (bf16)
        pl.BlockSpec(memory_space=pltpu.MemorySpace.SMEM),   # b3 scalar
    ]
    out_spec = pl.BlockSpec((1, 1, tile), lambda i: (i, 0, 0))
    out_shape = jax.ShapeDtypeStruct((num_tiles, 1, tile), jnp.float32)

    if fuse_gather:
        emb_c = emb.astype(compute_dtype)
        w1a = w1[:H, :].astype(compute_dtype)                # W1 rows for emb[col]
        w1b = w1[H:, :].astype(compute_dtype)                # W1 rows for emb[row]
        w2c = w2.astype(compute_dtype)
        col_t = col_p.reshape(num_tiles, 1, tile)
        row_t = row_p.reshape(num_tiles, 1, tile)

        bytes_accessed = (emb_bytes + 2 * E_pad * 4          # emb once + indices
                          + weight_bytes + E_pad * 4)        # weights + f32 out

        # VMEM budget: resident emb + double-buffered idx/out tiles + weights
        # + f32 h1/h2 intermediates, with 2x headroom.
        need = (emb_bytes + 2 * (2 * tile * 4 + tile * 4) + weight_bytes
                + tile * (H4 + Hm) * 4)
        vmem_limit = int(min(100 * 1024 * 1024,
                             max(32 * 1024 * 1024, 2 * need)))

        out = pl.pallas_call(
            _mlp_fused_gather_kernel,
            out_shape=out_shape,
            grid_spec=pltpu.PrefetchScalarGridSpec(
                num_scalar_prefetch=0,
                grid=(num_tiles,),
                in_specs=[
                    pl.BlockSpec((1, 1, tile), lambda i: (i, 0, 0)),  # col idx
                    pl.BlockSpec((1, 1, tile), lambda i: (i, 0, 0)),  # row idx
                    pl.BlockSpec((N, H), lambda i: (0, 0)),           # emb (resident)
                    pl.BlockSpec((H, H4), lambda i: (0, 0)),          # W1[:H] (bf16)
                    pl.BlockSpec((H, H4), lambda i: (0, 0)),          # W1[H:] (bf16)
                ] + const_specs,
                out_specs=out_spec,
            ),
            compiler_params=pltpu.CompilerParams(
                dimension_semantics=("parallel",),
                vmem_limit_bytes=vmem_limit,
            ),
            cost_estimate=pl.CostEstimate(
                flops=flops, transcendentals=0, bytes_accessed=bytes_accessed),
        )(col_t, row_t, emb_c, w1a, w1b, b1f, w2c, b2f, w3t, b3f)
    else:
        # Wrapper-side fused gather + concat + cast at padded length; the
        # kernel then streams the (E_pad, 2H) bf16 activation.
        f12 = jnp.concatenate([emb[col_p], emb[row_p]],
                              axis=-1).astype(compute_dtype)
        w1c = w1.astype(compute_dtype)
        w2c = w2.astype(compute_dtype)

        bytes_accessed = (2 * E_pad * H * 4                   # XLA gather reads
                          + E_pad * F_in * 2                  # f12 write (XLA)
                          + E_pad * F_in * 2                  # f12 read (kernel)
                          + weight_bytes + E_pad * 4)         # weights + f32 out

        out = pl.pallas_call(
            _mlp_kernel,
            out_shape=out_shape,
            grid_spec=pltpu.PrefetchScalarGridSpec(
                num_scalar_prefetch=0,
                grid=(num_tiles,),
                in_specs=[
                    pl.BlockSpec((tile, F_in), lambda i: (i, 0)),     # edge tile
                    pl.BlockSpec((F_in, H4), lambda i: (0, 0)),       # W1 (bf16)
                ] + const_specs,
                out_specs=out_spec,
            ),
            compiler_params=pltpu.CompilerParams(
                dimension_semantics=("parallel",),
            ),
            cost_estimate=pl.CostEstimate(
                flops=flops, transcendentals=0, bytes_accessed=bytes_accessed),
        )(f12, w1c, b1f, w2c, b2f, w3t, b3f)

    # (num_tiles, 1, tile) -> (E_pad, 1) -> strip padding rows.
    return out.reshape(E_pad, 1)[:E]


def init_params(key, hidden_size, dtype=jnp.float32):
    """Deterministic init of MLP([2H, 4H, H, 1]) parameters (Linear: y = x W + b)."""
    dims = [2 * hidden_size, 4 * hidden_size, hidden_size, 1]
    params = []
    for i in range(len(dims) - 1):
        key, kw, kb = jax.random.split(key, 3)
        fan_in = dims[i]
        bound = 1.0 / jnp.sqrt(fan_in)
        w = jax.random.uniform(kw, (dims[i], dims[i + 1]), dtype, -bound, bound)
        b = jax.random.uniform(kb, (1, dims[i + 1]), dtype, -bound, bound)
        params += [w, b]
    return tuple(params)


def reference_forward(emb, edge_index, params, compute_dtype=jnp.bfloat16):
    """Pure-JAX reference with the same bf16-operand / f32-accumulate recipe."""
    w1, b1, w2, b2, w3, b3 = params
    col, row = edge_index[0], edge_index[1]
    f12 = jnp.concatenate([emb[col], emb[row]], axis=-1).astype(compute_dtype)
    h1 = jnp.dot(f12, w1.astype(compute_dtype),
                 preferred_element_type=jnp.float32) + b1
    h1 = jnp.maximum(h1, 0.0)
    h2 = jnp.dot(h1.astype(compute_dtype), w2.astype(compute_dtype),
                 preferred_element_type=jnp.float32) + b2
    h2 = jnp.maximum(h2, 0.0)
    out = jnp.dot(h2.astype(compute_dtype), w3.astype(compute_dtype),
                  preferred_element_type=jnp.float32) + b3
    return out


if __name__ == "__main__":
    key = jax.random.PRNGKey(0)
    hidden_size = 32
    num_nodes = 64
    num_edges = 300

    k_emb, k_col, k_row, k_param = jax.random.split(key, 4)
    emb = jax.random.normal(k_emb, (num_nodes, hidden_size), jnp.float32)
    col = jax.random.randint(k_col, (num_edges,), 0, num_nodes, jnp.int32)
    row = jax.random.randint(k_row, (num_edges,), 0, num_nodes, jnp.int32)
    edge_index = jnp.stack([col, row], axis=0)                  # [2, E]
    batch = jnp.zeros((num_nodes,), jnp.int32)                  # unused (see TODO)

    params = init_params(k_param, hidden_size)
    ref = reference_forward(emb, edge_index, params)

    att_log_logits = None
    try:
        # Primary path: fused in-kernel edge gather with emb resident in VMEM.
        att_log_logits = extractor_mlp_forward(emb, edge_index, params,
                                               fuse_gather=True)
        att_log_logits = jax.block_until_ready(att_log_logits)
        if not bool(jnp.allclose(att_log_logits, ref, atol=1e-2, rtol=1e-2)):
            att_log_logits = None
    except Exception:
        att_log_logits = None
    if att_log_logits is None:
        # TODO(synk): the in-kernel dynamic row gather requires Mosaic
        # dynamic-gather support; fall back to the wrapper-side gather path.
        att_log_logits = extractor_mlp_forward(emb, edge_index, params,
                                               fuse_gather=False)
        att_log_logits = jax.block_until_ready(att_log_logits)

    assert att_log_logits.shape == (num_edges, 1)
    assert jnp.allclose(att_log_logits, ref, atol=1e-2, rtol=1e-2), (
        float(jnp.max(jnp.abs(att_log_logits - ref))))

    print("KERNEL_OK")
</pallas_src>

<mosaic_0001>
module attributes {stable_mosaic.version = 11 : i64} {
  func.func @_mlp_kernel(%arg0: i32, %arg1: memref<256x64xbf16, #tpu.memory_space<vmem>>, %arg2: memref<64x128xbf16, #tpu.memory_space<vmem>>, %arg3: memref<1x128xf32, #tpu.memory_space<vmem>>, %arg4: memref<128x32xbf16, #tpu.memory_space<vmem>>, %arg5: memref<1x32xf32, #tpu.memory_space<vmem>>, %arg6: memref<1x32xbf16, #tpu.memory_space<vmem>>, %arg7: memref<1x1xf32, #tpu.memory_space<smem>>, %arg8: memref<1x1x256xf32, #tpu.memory_space<vmem>>) attributes {dimension_semantics = [#tpu.dimension_semantics<parallel>], iteration_bounds = array<i64: 2>, scalar_prefetch = 0 : i64, scratch_operands = 0 : i64, tpu.core_type = #tpu.core_type<tc>, window_params = [{transform_indices = @transform_0, window_bounds = array<i64: 256, 64>}, {pipeline_mode = #tpu.pipeline_mode<synchronous>, transform_indices = @transform_1, window_bounds = array<i64: 64, 128>}, {pipeline_mode = #tpu.pipeline_mode<synchronous>, transform_indices = @transform_2, window_bounds = array<i64: 1, 128>}, {pipeline_mode = #tpu.pipeline_mode<synchronous>, transform_indices = @transform_3, window_bounds = array<i64: 128, 32>}, {pipeline_mode = #tpu.pipeline_mode<synchronous>, transform_indices = @transform_4, window_bounds = array<i64: 1, 32>}, {pipeline_mode = #tpu.pipeline_mode<synchronous>, transform_indices = @transform_5, window_bounds = array<i64: 1, 32>}, {transform_indices = @transform_6, window_bounds = array<i64: 1, 1>}, {transform_indices = @transform_7, window_bounds = array<i64: 1, 1, 256>}]} {
    %c0 = arith.constant 0 : index
    %c0_0 = arith.constant 0 : index
    %0 = vector.load %arg1[%c0, %c0_0] : memref<256x64xbf16, #tpu.memory_space<vmem>>, vector<256x64xbf16>
    %c0_1 = arith.constant 0 : index
    %c0_2 = arith.constant 0 : index
    %1 = vector.load %arg2[%c0_1, %c0_2] : memref<64x128xbf16, #tpu.memory_space<vmem>>, vector<64x128xbf16>
    %cst = arith.constant dense<0.000000e+00> : vector<256x128xf32>
    %2 = tpu.matmul %0, %1, %cst {dimension_numbers = #tpu.dot_dimension_numbers<[1], [0], [0], [1], [0, 0, 1, 1], [], []>} : vector<256x64xbf16>, vector<64x128xbf16>, vector<256x128xf32> -> vector<256x128xf32>
    %c0_3 = arith.constant 0 : index
    %c0_4 = arith.constant 0 : index
    %3 = vector.load %arg3[%c0_3, %c0_4] : memref<1x128xf32, #tpu.memory_space<vmem>>, vector<1x128xf32>
    %4 = vector.broadcast %3 : vector<1x128xf32> to vector<256x128xf32>
    %5 = arith.addf %2, %4 : vector<256x128xf32>
    %cst_5 = arith.constant 0.000000e+00 : f32
    %6 = vector.broadcast %cst_5 : f32 to vector<256x128xf32>
    %7 = arith.maximumf %5, %6 : vector<256x128xf32>
    %8 = arith.truncf %7 : vector<256x128xf32> to vector<256x128xbf16>
    %c0_6 = arith.constant 0 : index
    %c0_7 = arith.constant 0 : index
    %9 = vector.load %arg4[%c0_6, %c0_7] : memref<128x32xbf16, #tpu.memory_space<vmem>>, vector<128x32xbf16>
    %cst_8 = arith.constant dense<0.000000e+00> : vector<256x32xf32>
    %10 = tpu.matmul %8, %9, %cst_8 {dimension_numbers = #tpu.dot_dimension_numbers<[1], [0], [0], [1], [0, 0, 1, 1], [], []>} : vector<256x128xbf16>, vector<128x32xbf16>, vector<256x32xf32> -> vector<256x32xf32>
    %c0_9 = arith.constant 0 : index
    %c0_10 = arith.constant 0 : index
    %11 = vector.load %arg5[%c0_9, %c0_10] : memref<1x32xf32, #tpu.memory_space<vmem>>, vector<1x32xf32>
    %12 = vector.broadcast %11 : vector<1x32xf32> to vector<256x32xf32>
    %13 = arith.addf %10, %12 : vector<256x32xf32>
    %cst_11 = arith.constant 0.000000e+00 : f32
    %14 = vector.broadcast %cst_11 : f32 to vector<256x32xf32>
    %15 = arith.maximumf %13, %14 : vector<256x32xf32>
    %c0_12 = arith.constant 0 : index
    %c0_13 = arith.constant 0 : index
    %16 = vector.load %arg6[%c0_12, %c0_13] : memref<1x32xbf16, #tpu.memory_space<vmem>>, vector<1x32xbf16>
    %17 = arith.truncf %15 : vector<256x32xf32> to vector<256x32xbf16>
    %cst_14 = arith.constant dense<0.000000e+00> : vector<1x256xf32>
    %18 = tpu.matmul %16, %17, %cst_14 {dimension_numbers = #tpu.dot_dimension_numbers<[1], [1], [0], [0], [0, 0, 1, 0], [], []>} : vector<1x32xbf16>, vector<256x32xbf16>, vector<1x256xf32> -> vector<1x256xf32>
    %c0_15 = arith.constant 0 : index
    %c0_16 = arith.constant 0 : index
    %19 = memref.load %arg7[%c0_15, %c0_16] : memref<1x1xf32, #tpu.memory_space<smem>>
    %20 = vector.broadcast %19 : f32 to vector<1x256xf32>
    %21 = arith.addf %18, %20 : vector<1x256xf32>
    %22 = vector.shape_cast %21 : vector<1x256xf32> to vector<1x1x256xf32>
    %c0_17 = arith.constant 0 : index
    %c0_18 = arith.constant 0 : index
    %c0_19 = arith.constant 0 : index
    %23 = vector.load %arg8[%c0_17, %c0_18, %c0_19] : memref<1x1x256xf32, #tpu.memory_space<vmem>>, vector<1x1x256xf32>
    tpu.vector_store %arg8[%c0_17, %c0_18, %c0_19], %22 {strides = array<i32>} : memref<1x1x256xf32, #tpu.memory_space<vmem>>, vector<1x1x256xf32>,
    return
  }
  func.func @transform_0(%arg0: i32) -> (i32, i32) {
    %c0_i32 = arith.constant 0 : i32
    %c0_i32_0 = arith.constant 0 : i32
    return %arg0, %c0_i32 : i32, i32
  }
  func.func @transform_1(%arg0: i32) -> (i32, i32) {
    %c0_i32 = arith.constant 0 : i32
    %c0_i32_0 = arith.constant 0 : i32
    %c0_i32_1 = arith.constant 0 : i32
    return %c0_i32, %c0_i32_0 : i32, i32
  }
  func.func @transform_2(%arg0: i32) -> (i32, i32) {
    %c0_i32 = arith.constant 0 : i32
    %c0_i32_0 = arith.constant 0 : i32
    %c0_i32_1 = arith.constant 0 : i32
    return %c0_i32, %c0_i32_0 : i32, i32
  }
  func.func @transform_3(%arg0: i32) -> (i32, i32) {
    %c0_i32 = arith.constant 0 : i32
    %c0_i32_0 = arith.constant 0 : i32
    %c0_i32_1 = arith.constant 0 : i32
    return %c0_i32, %c0_i32_0 : i32, i32
  }
  func.func @transform_4(%arg0: i32) -> (i32, i32) {
    %c0_i32 = arith.constant 0 : i32
    %c0_i32_0 = arith.constant 0 : i32
    %c0_i32_1 = arith.constant 0 : i32
    return %c0_i32, %c0_i32_0 : i32, i32
  }
  func.func @transform_5(%arg0: i32) -> (i32, i32) {
    %c0_i32 = arith.constant 0 : i32
    %c0_i32_0 = arith.constant 0 : i32
    %c0_i32_1 = arith.constant 0 : i32
    return %c0_i32, %c0_i32_0 : i32, i32
  }
  func.func @transform_6(%arg0: i32) -> (i32, i32) {
    %c0_i32 = arith.constant 0 : i32
    %c0_i32_0 = arith.constant 0 : i32
    %c0_i32_1 = arith.constant 0 : i32
    return %c0_i32, %c0_i32_0 : i32, i32
  }
  func.func @transform_7(%arg0: i32) -> (i32, i32, i32) {
    %c0_i32 = arith.constant 0 : i32
    %c0_i32_0 = arith.constant 0 : i32
    %c0_i32_1 = arith.constant 0 : i32
    return %arg0, %c0_i32, %c0_i32_0 : i32, i32, i32
  }
}

</mosaic_0001>

<bundles_post_ra>
// kernel: extractor_mlp_forward.1
= control target key start
LH: loop header
LB: loop body
LE: loop exit
PB: predicated region body
PF: predicated region fallthrough
CT: control target
= control target key end

     0   :  { %s1446_s26 = smov 0   ;;  %s1661_s0 = inlined_call_operand.vmem [shape: bf16[512,64], index: 0, kind: input, shape index: {}]   ;;  %s1662_s1 = inlined_call_operand.vmem [shape: bf16[64,128], index: 1, kind: input, shape index: {}]   ;;  %s1663_s2 = inlined_call_operand.vmem [shape: f32[1,128], index: 2, kind: input, shape index: {}]   ;;  %s1664_s3 = inlined_call_operand.vmem [shape: bf16[128,32], index: 3, kind: input, shape index: {}]   ;;  %s1665_s4 = inlined_call_operand.vmem [shape: f32[1,32], index: 4, kind: input, shape index: {}]   ;;  %s1666_s5 = inlined_call_operand.vmem [shape: bf16[1,32], index: 5, kind: input, shape index: {}]   ;;  %s1667_s6 = inlined_call_operand.<no memory space> [shape: f32[1,1], index: 6, kind: input, shape index: {}]   ;;  %s1668_s7 = inlined_call_operand.vmem [shape: f32[2,1,256], index: 7, kind: output, shape index: {}]  }
   0x1   :  { %12 = sst [smem:[#allocation2]] %s1667_s6 }
   0x2 LB: > { %s1452_s27 = sadd.s32 4294967295, %s1400_s26   ;;  %p1146_p0 = scmp.ge.s32.totalorder %s1400_s26, 1  ;;  %s1400_s26 = sphi %s1446_s26, %s18_s26  }
   0x3   : > { %p239_p1 = scmp.lt.s32.totalorder %s1400_s26, 3 }
   0x5   : > { %p240_p2 = pnand %p1146_p0, %p239_p1 }
   0x6   : > { %v1366_v0 = vld [vmem:[%s1662_s1] sm:$0xff] (!%p240_p2)   ;;  %s1147_s6 = sshll.u32 (!%p240_p2), %s1452_s27, 5  ;;  %v1367_v1 = vld [vmem:[%s1662_s1 + $0x8] sm:$0xff] (!%p240_p2)   ;;  %v1368_v2 = vld [vmem:[%s1662_s1 + $0x10] sm:$0xff] (!%p240_p2)   ;;  %vm432_vm0 = vcmask (!%p240_p2), 523264   ;;  %vm973_vm1 = vcmask (!%p240_p2), 261120  }
   0x7   : > { %243 = sbr.rel (%p240_p2) target bundleno = 784 (0x310), region = 48  ;;  %p271_p3 = scmp.lt.s32.totalorder (!%p240_p2), %s1147_s6, 63  ;;  %1261 = vmatprep.subr.bf16.mxu0 (!%p240_p2), %v1366_v0  ;;  %v1386_v3 = vld [vmem:[%s1664_s3] sm:$0xff] (!%p240_p2)   ;;  %v1387_v4 = vld [vmem:[%s1664_s3 + $0x8] sm:$0xff] (!%p240_p2)   ;;  %v1369_v5 = vld [vmem:[%s1662_s1 + $0x18] sm:$0xff] (!%p240_p2)  }
   0x8   : > { %1262 = vmatpush3.bf16.msra.mxu0 (!%p240_p2), %v1366_v0  ;;  %1301 = vmatprep.subr.bf16.mxu1 (!%p240_p2), %v1386_v3  ;;  %v1388_v7 = vld [vmem:[%s1664_s3 + $0x10] sm:$0xff] (!%p240_p2)   ;;  %v1389_v12 = vld [vmem:[%s1664_s3 + $0x18] sm:$0xff] (!%p240_p2)   ;;  %v1390_v13 = vld [vmem:[%s1664_s3 + $0x20] sm:$0xff] (!%p240_p2)   ;;  %s971_s17 = sld [smem:[#allocation2]] (!%p240_p2)  ;;  %p276_p4 = scmp.lt.s32.totalorder (!%p240_p2), %s1452_s27, 1 }
   0x9   : > { %1263 = vmatprep.subr.bf16.mxu0 (!%p240_p2), %v1367_v1  ;;  %1302 = vmatpush3.bf16.msra.mxu1 (!%p240_p2), %v1386_v3  ;;  %v1391_v14 = vld [vmem:[%s1664_s3 + $0x28] sm:$0xff] (!%p240_p2)   ;;  %v1392_v26 = vld [vmem:[%s1664_s3 + $0x30] sm:$0xff] (!%p240_p2)   ;;  %v1393_v27 = vld [vmem:[%s1664_s3 + $0x38] sm:$0xff] (!%p240_p2)  }
   0xa   : > { %1303 = vmatprep.subr.bf16.mxu1 (!%p240_p2), %v1387_v4  ;;  %v1533_v28 = vld [vmem:[%s1663_s2] ss:$0 sm:$0xff] (!%p240_p2) }
   0xc   : > { %1264 = vmatpush3.bf16.msra.mxu0 (!%p240_p2), %v1367_v1 }
   0xd   : > { %1265 = vmatprep.subr.bf16.mxu0 (!%p240_p2), %v1368_v2  ;;  %1304 = vmatpush3.bf16.msra.mxu1 (!%p240_p2), %v1387_v4 }
   0xe   : > { %s1670_s6 = smov (!%p271_p3, %s1147_s6), 63  ;;  %1305 = vmatprep.subr.bf16.mxu1 %v1388_v7  ;;  %s1672_s27 = smov (!%p276_p4, %s1452_s27), 1 }
   0xf   : > { %s1148_s13 = sshll.u32 %s1670_s6, 2  ;;  %s1149_s18 = sshll.u32 %s1672_s27, 1 }
  0x10   : > { %s1478_s20 = scalar_lea.vmem %s1661_s0, %s1148_s13  ;;  %1266 = vmatpush3.bf16.msra.mxu0 %v1368_v2  ;;  %s279_s21 = scalar_lea.vmem %s1668_s7, %s1149_s18 }
  0x11   : > { %v1370_v6 = vld [vmem:[%s1478_s20] sm:$0xff]   ;;  %1267 = vmatprep.subr.bf16.mxu0 %v1369_v5  ;;  %v1371_v8 = vld [vmem:[%s1478_s20 + $0x8] sm:$0xff]   ;;  %v1372_v9 = vld [vmem:[%s1478_s20 + $0x10] sm:$0xff]   ;;  %1306 = vmatpush3.bf16.msra.mxu1 %v1388_v7 }
  0x12   : > { %1269 = vmatprep.mubr.msk.bf16.mxu0 %vm432_vm0, %v1370_v6  ;;  %v1373_v10 = vld [vmem:[%s1478_s20 + $0x18] sm:$0xff]   ;;  %v1374_v11 = vld [vmem:[%s1478_s20 + $0x20] sm:$0xff]   ;;  %1307 = vmatprep.subr.bf16.mxu1 %v1389_v12  ;;  %v1375_v15 = vld [vmem:[%s1478_s20 + $0x28] sm:$0xff]  }
  0x13   : > { %v1376_v16 = vld [vmem:[%s1478_s20 + $0x30] sm:$0xff]   ;;  %v1377_v17 = vld [vmem:[%s1478_s20 + $0x38] sm:$0xff]   ;;  %v1378_v18 = vld [vmem:[%s1478_s20 + $0x40] sm:$0xff]  }
  0x14   : > { %1268 = vmatpush3.bf16.msra.mxu0 %v1369_v5  ;;  %v1379_v19 = vld [vmem:[%s1478_s20 + $0x48] sm:$0xff]   ;;  %v1380_v20 = vld [vmem:[%s1478_s20 + $0x50] sm:$0xff]   ;;  %v1381_v21 = vld [vmem:[%s1478_s20 + $0x58] sm:$0xff]  }
  0x15   : > { %1308 = vmatpush3.bf16.msra.mxu1 %v1389_v12  ;;  %v1382_v22 = vld [vmem:[%s1478_s20 + $0x60] sm:$0xff]   ;;  %v1383_v23 = vld [vmem:[%s1478_s20 + $0x68] sm:$0xff]   ;;  %v1384_v24 = vld [vmem:[%s1478_s20 + $0x70] sm:$0xff]  }
  0x16   : > { %1309 = vmatprep.subr.bf16.mxu1 %v1390_v13  ;;  %v1385_v25 = vld [vmem:[%s1478_s20 + $0x78] sm:$0xff]  }
  0x17   : > { %1270 = vmatmul.mubr.msk.bf16.vlgmr.msra.gmra.mrb[0].mxu0 %vm432_vm0, %v1371_v8 }
  0x18   : > { %1273 = vmatprep.mubr.msk.bf16.mxu0 %vm432_vm0, %v1372_v9 }
  0x19   : > { %1310 = vmatpush3.bf16.msra.mxu1 %v1390_v13 }
  0x1a   : > { %1311 = vmatprep.subr.bf16.mxu1 %v1391_v14 }
  0x1d   : > { %1312 = vmatpush3.bf16.msra.mxu1 %v1391_v14 }
  0x1e   : > { %1313 = vmatprep.subr.bf16.mxu1 %v1392_v26 }
  0x1f   : > { %1274 = vmatmul.mubr.msk.bf16.gmra.mrb[4].mxu0 %vm432_vm0, %v1373_v10 }
  0x20   : > { %1277 = vmatprep.mubr.msk.bf16.mxu0 %vm432_vm0, %v1374_v11 }
  0x21   : > { %1314 = vmatpush3.bf16.msra.mxu1 %v1392_v26 }
  0x22   : > { %1315 = vmatprep.subr.bf16.mxu1 %v1393_v27 }
  0x25   : > { %1316 = vmatpush3.bf16.msra.mxu1 %v1393_v27 }
  0x27   : > { %1278 = vmatmul.mubr.msk.bf16.gmra.mrb[8].mxu0 %vm432_vm0, %v1375_v15 }
  0x28   : > { %1281 = vmatprep.mubr.msk.bf16.mxu0 %vm432_vm0, %v1376_v16 }
  0x2f   : > { %1282 = vmatmul.mubr.msk.bf16.gmra.mrb[12].mxu0 %vm432_vm0, %v1377_v17 }
  0x30   : > { %1285 = vmatprep.mubr.msk.bf16.mxu0 %vm432_vm0, %v1378_v18 }
  0x37   : > { %1286 = vmatmul.mubr.msk.bf16.gmra.mrb[16].mxu0 %vm432_vm0, %v1379_v19 }
  0x38   : > { %1289 = vmatprep.mubr.msk.bf16.mxu0 %vm432_vm0, %v1380_v20 }
  0x3f   : > { %1290 = vmatmul.mubr.msk.bf16.gmra.mrb[20].mxu0 %vm432_vm0, %v1381_v21 }
  0x40   : > { %1293 = vmatprep.mubr.msk.bf16.mxu0 %vm432_vm0, %v1382_v22 }
  0x47   : > { %1294 = vmatmul.mubr.msk.bf16.gmra.mrb[24].mxu0 %vm432_vm0, %v1383_v23 }
  0x48   : > { %1297 = vmatprep.mubr.msk.bf16.mxu0 %vm432_vm0, %v1384_v24 }
  0x4f   : > { %1298 = vmatmul.mubr.msk.bf16.gmra.mrb[28].mxu0 %vm432_vm0, %v1385_v25 }
  0xea   : > { %v1271_v29 = vpop.f32.mrb[0].mxu0 }
  0xeb   : > { %v524_v30 = vadd.f32 %v1271_v29, %v1533_v28  ;;  %v515_v31 = vpop.f32.mrb[1].mxu0 }
  0xec   : > { %v516_v32 = vadd.f32 %v1533_v28, %v515_v31  ;;  %v1272_v33 = vpop.f32.mrb[2].mxu0 }
  0xed   : > { %v527_v34 = vadd.f32 %v1272_v33, %v1533_v28  ;;  %v518_v35 = vpop.f32.mrb[3].mxu0  ;;  %v644_v37 = vmax.f32 %v524_v30, 0.0 }
  0xee   : > { %v519_v36 = vadd.f32 %v1533_v28, %v518_v35  ;;  %v642_v39 = vmax.f32 %v516_v32, 0.0 }
  0xef   : > { %v645_v38 = vmax.f32 %v527_v34, 0.0 }
  0xf0   : > { %v643_v40 = vmax.f32 %v519_v36, 0.0 }
  0xf1   : > { %v675_v41 = vpack.c.bf16 %v645_v38, %v644_v37 }
  0xf2   : > { %v1275_v42 = vpop.f32.mrb[4].mxu0  ;;  %v674_v43 = vpack.c.bf16 %v643_v40, %v642_v39 }
  0xf3   : > { %v540_v44 = vadd.f32 %v1275_v42, %v1533_v28  ;;  %v531_v45 = vpop.f32.mrb[5].mxu0 }
  0xf4   : > { %v532_v46 = vadd.f32 %v1533_v28, %v531_v45  ;;  %v1276_v47 = vpop.f32.mrb[6].mxu0  ;;  %1317 = vmatprep.mubr.bf16.mxu1 %v674_v43 }
  0xf5   : > { %v543_v48 = vadd.f32 %v1276_v47, %v1533_v28  ;;  %v534_v49 = vpop.f32.mrb[7].mxu0  ;;  %1318 = vmatmul.mubr.bf16.vlgmr.msra.gmra.mrb[0].mxu1 %v675_v41  ;;  %v648_v51 = vmax.f32 %v540_v44, 0.0 }
  0xf6   : > { %v535_v50 = vadd.f32 %v1533_v28, %v534_v49  ;;  %v646_v53 = vmax.f32 %v532_v46, 0.0 }
  0xf7   : > { %v649_v52 = vmax.f32 %v543_v48, 0.0 }
  0xf8   : > { %v647_v54 = vmax.f32 %v535_v50, 0.0 }
  0xf9   : > { %v677_v55 = vpack.c.bf16 %v649_v52, %v648_v51 }
  0xfa   : > { %v676_v56 = vpack.c.bf16 %v647_v54, %v646_v53  ;;  %v1279_v57 = vpop.f32.mrb[8].mxu0 }
  0xfb   : > { %v556_v58 = vadd.f32 %v1279_v57, %v1533_v28  ;;  %v547_v59 = vpop.f32.mrb[9].mxu0 }
  0xfc   : > { %v548_v60 = vadd.f32 %v1533_v28, %v547_v59  ;;  %v1280_v61 = vpop.f32.mrb[10].mxu0  ;;  %1321 = vmatprep.mubr.bf16.mxu1 %v676_v56 }
  0xfd   : > { %v559_v62 = vadd.f32 %v1280_v61, %v1533_v28  ;;  %v550_v63 = vpop.f32.mrb[11].mxu0  ;;  %1322 = vmatmul.mubr.bf16.gmra.mrb[4].mxu1 %v677_v55  ;;  %v652_v1 = vmax.f32 %v556_v58, 0.0 }
  0xfe   : > { %v551_v0 = vadd.f32 %v1533_v28, %v550_v63  ;;  %v650_v3 = vmax.f32 %v548_v60, 0.0 }
  0xff   : > { %v653_v2 = vmax.f32 %v559_v62, 0.0 }
 0x100   : > { %v651_v4 = vmax.f32 %v551_v0, 0.0 }
 0x101   : > { %v679_v5 = vpack.c.bf16 %v653_v2, %v652_v1 }
 0x102   : > { %v678_v6 = vpack.c.bf16 %v651_v4, %v650_v3  ;;  %v1283_v7 = vpop.f32.mrb[12].mxu0 }
 0x103   : > { %v572_v8 = vadd.f32 %v1283_v7, %v1533_v28  ;;  %v563_v9 = vpop.f32.mrb[13].mxu0 }
 0x104   : > { %v564_v10 = vadd.f32 %v1533_v28, %v563_v9  ;;  %v1284_v11 = vpop.f32.mrb[14].mxu0  ;;  %1325 = vmatprep.mubr.bf16.mxu1 %v678_v6 }
 0x105   : > { %v575_v12 = vadd.f32 %v1284_v11, %v1533_v28  ;;  %v566_v13 = vpop.f32.mrb[15].mxu0  ;;  %1326 = vmatmul.mubr.bf16.gmra.mrb[8].mxu1 %v679_v5  ;;  %v656_v15 = vmax.f32 %v572_v8, 0.0 }
 0x106   : > { %v567_v14 = vadd.f32 %v1533_v28, %v566_v13  ;;  %v654_v17 = vmax.f32 %v564_v10, 0.0 }
 0x107   : > { %v657_v16 = vmax.f32 %v575_v12, 0.0 }
 0x108   : > { %v655_v18 = vmax.f32 %v567_v14, 0.0  ;;  %v1570_v14 = vld [vmem:[%s1666_s5] sm:$0x1] }
 0x109   : > { %v681_v19 = vpack.c.bf16 %v657_v16, %v656_v15  ;;  %1259 = vmatprep.mubr.msk.bf16.mxu0 %vm973_vm1, %v1570_v14  ;;  %v1577_v15 = vld [vmem:[%s1665_s4] ss:$0 sm:$0xff] }
 0x10a   : > { %v680_v20 = vpack.c.bf16 %v655_v18, %v654_v17  ;;  %v1287_v21 = vpop.f32.mrb[16].mxu0 }
 0x10b   : > { %v588_v22 = vadd.f32 %v1287_v21, %v1533_v28  ;;  %v579_v23 = vpop.f32.mrb[17].mxu0 }
 0x10c   : > { %v580_v24 = vadd.f32 %v1533_v28, %v579_v23  ;;  %v1288_v25 = vpop.f32.mrb[18].mxu0  ;;  %1329 = vmatprep.mubr.bf16.mxu1 %v680_v20 }
 0x10d   : > { %v591_v26 = vadd.f32 %v1288_v25, %v1533_v28  ;;  %v582_v27 = vpop.f32.mrb[19].mxu0  ;;  %1330 = vmatmul.mubr.bf16.gmra.mrb[12].mxu1 %v681_v19  ;;  %v660_v30 = vmax.f32 %v588_v22, 0.0 }
 0x10e   : > { %v583_v29 = vadd.f32 %v1533_v28, %v582_v27  ;;  %v658_v32 = vmax.f32 %v580_v24, 0.0 }
 0x10f   : > { %v661_v31 = vmax.f32 %v591_v26, 0.0 }
 0x110   : > { %v659_v33 = vmax.f32 %v583_v29, 0.0 }
 0x111   : > { %v683_v34 = vpack.c.bf16 %v661_v31, %v660_v30 }
 0x112   : > { %v682_v35 = vpack.c.bf16 %v659_v33, %v658_v32  ;;  %v1291_v36 = vpop.f32.mrb[20].mxu0 }
 0x113   : > { %v604_v37 = vadd.f32 %v1291_v36, %v1533_v28  ;;  %v595_v38 = vpop.f32.mrb[21].mxu0 }
 0x114   : > { %v596_v39 = vadd.f32 %v1533_v28, %v595_v38  ;;  %1333 = vmatprep.mubr.bf16.mxu1 %v682_v35  ;;  %v1292_v40 = vpop.f32.mrb[22].mxu0 }
 0x115   : > { %v664_v41 = vmax.f32 %v604_v37, 0.0  ;;  %v607_v42 = vadd.f32 %v1292_v40, %v1533_v28  ;;  %1334 = vmatmul.mubr.bf16.gmra.mrb[16].mxu1 %v683_v34  ;;  %v598_v43 = vpop.f32.mrb[23].mxu0 }
 0x116   : > { %v662_v44 = vmax.f32 %v596_v39, 0.0  ;;  %v599_v45 = vadd.f32 %v1533_v28, %v598_v43 }
 0x117   : > { %v665_v46 = vmax.f32 %v607_v42, 0.0 }
 0x118   : > { %v663_v47 = vmax.f32 %v599_v45, 0.0 }
 0x119   : > { %v685_v48 = vpack.c.bf16 %v665_v46, %v664_v41 }
 0x11a   : > { %v684_v49 = vpack.c.bf16 %v663_v47, %v662_v44  ;;  %v1295_v50 = vpop.f32.mrb[24].mxu0 }
 0x11b   : > { %v620_v51 = vadd.f32 %v1295_v50, %v1533_v28  ;;  %v611_v52 = vpop.f32.mrb[25].mxu0 }
 0x11c   : > { %1337 = vmatprep.mubr.bf16.mxu1 %v684_v49  ;;  %v612_v53 = vadd.f32 %v1533_v28, %v611_v52  ;;  %v1296_v54 = vpop.f32.mrb[26].mxu0 }
 0x11d   : > { %1338 = vmatmul.mubr.bf16.gmra.mrb[20].mxu1 %v685_v48  ;;  %v668_v55 = vmax.f32 %v620_v51, 0.0  ;;  %v623_v56 = vadd.f32 %v1296_v54, %v1533_v28  ;;  %v614_v57 = vpop.f32.mrb[27].mxu0 }
 0x11e   : > { %v666_v58 = vmax.f32 %v612_v53, 0.0  ;;  %v615_v59 = vadd.f32 %v1533_v28, %v614_v57 }
 0x11f   : > { %v669_v60 = vmax.f32 %v623_v56, 0.0 }
 0x120   : > { %v667_v61 = vmax.f32 %v615_v59, 0.0 }
 0x121   : > { %v687_v62 = vpack.c.bf16 %v669_v60, %v668_v55 }
 0x122   : > { %v686_v63 = vpack.c.bf16 %v667_v61, %v666_v58  ;;  %v1299_v0 = vpop.f32.mrb[28].mxu0 }
 0x123   : > { %v636_v1 = vadd.f32 %v1299_v0, %v1533_v28  ;;  %v627_v2 = vpop.f32.mrb[29].mxu0 }
 0x124   : > { %1341 = vmatprep.mubr.bf16.mxu1 %v686_v63  ;;  %v628_v3 = vadd.f32 %v1533_v28, %v627_v2  ;;  %v1300_v4 = vpop.f32.mrb[30].mxu0 }
 0x125   : > { %1342 = vmatmul.mubr.bf16.gmra.mrb[24].mxu1 %v687_v62  ;;  %v672_v5 = vmax.f32 %v636_v1, 0.0  ;;  %v639_v6 = vadd.f32 %v1300_v4, %v1533_v28  ;;  %v630_v7 = vpop.f32.mrb[31].mxu0 }
 0x126   : > { %v670_v8 = vmax.f32 %v628_v3, 0.0  ;;  %v631_v9 = vadd.f32 %v1533_v28, %v630_v7 }
 0x127   : > { %v673_v10 = vmax.f32 %v639_v6, 0.0 }
 0x128   : > { %v671_v11 = vmax.f32 %v631_v9, 0.0 }
 0x129   : > { %v689_v12 = vpack.c.bf16 %v673_v10, %v672_v5 }
 0x12a   : > { %v688_v13 = vpack.c.bf16 %v671_v11, %v670_v8 }
 0x12c   : > { %1345 = vmatprep.mubr.bf16.mxu1 %v688_v13 }
 0x12d   : > { %1346 = vmatmul.mubr.bf16.gmra.mrb[28].mxu1 %v689_v12 }
 0x1c8   : > { %v1319_v28 = vpop.f32.mrb[0].mxu1 }
 0x1c9   : > { %v804_v16 = vadd.f32 %v1319_v28, %v1577_v15  ;;  %v795_v17 = vpop.f32.mrb[1].mxu1 }
 0x1ca   : > { %v796_v18 = vadd.f32 %v1577_v15, %v795_v17  ;;  %v1320_v19 = vpop.f32.mrb[2].mxu1 }
 0x1cb   : > { %v807_v20 = vadd.f32 %v1320_v19, %v1577_v15  ;;  %v798_v21 = vpop.f32.mrb[3].mxu1  ;;  %v924_v23 = vmax.f32 %v804_v16, 0.0 }
 0x1cc   : > { %v799_v22 = vadd.f32 %v1577_v15, %v798_v21  ;;  %v922_v25 = vmax.f32 %v796_v18, 0.0 }
 0x1cd   : > { %v925_v24 = vmax.f32 %v807_v20, 0.0 }
 0x1ce   : > { %v923_v26 = vmax.f32 %v799_v22, 0.0 }
 0x1cf   : > { %v1583_v27 = vpack.c.bf16 %v925_v24, %v924_v23 }
 0x1d0   : > { %v1585_v29 = vpack.c.bf16 %v923_v26, %v922_v25  ;;  %v1323_v30 = vpop.f32.mrb[4].mxu1 }
 0x1d1   : > { %v820_v31 = vadd.f32 %v1323_v30, %v1577_v15  ;;  %v811_v32 = vpop.f32.mrb[5].mxu1 }
 0x1d2   : > { %v812_v33 = vadd.f32 %v1577_v15, %v811_v32  ;;  %v1324_v34 = vpop.f32.mrb[6].mxu1 }
 0x1d3   : > { %v823_v35 = vadd.f32 %v1324_v34, %v1577_v15  ;;  %v814_v36 = vpop.f32.mrb[7].mxu1  ;;  %v928_v38 = vmax.f32 %v820_v31, 0.0  ;;  %v978_v31 = vsel %vm973_vm1, %v1585_v29, 0  ;;  %v981_v29 = vsel %vm973_vm1, %v1583_v27, 0 }
 0x1d4   : > { %v815_v37 = vadd.f32 %v1577_v15, %v814_v36  ;;  %v926_v40 = vmax.f32 %v812_v33, 0.0 }
 0x1d5   : > { %v929_v39 = vmax.f32 %v823_v35, 0.0 }
 0x1d6   : > { %v927_v41 = vmax.f32 %v815_v37, 0.0 }
 0x1d7   : > { %v1591_v42 = vpack.c.bf16 %v929_v39, %v928_v38 }
 0x1d8   : > { %v1593_v43 = vpack.c.bf16 %v927_v41, %v926_v40  ;;  %v1327_v44 = vpop.f32.mrb[8].mxu1 }
 0x1d9   : > { %v836_v45 = vadd.f32 %v1327_v44, %v1577_v15  ;;  %v827_v46 = vpop.f32.mrb[9].mxu1 }
 0x1da   : > { %v828_v47 = vadd.f32 %v1577_v15, %v827_v46  ;;  %v1328_v48 = vpop.f32.mrb[10].mxu1 }
 0x1db   : > { %v839_v49 = vadd.f32 %v1328_v48, %v1577_v15  ;;  %v830_v50 = vpop.f32.mrb[11].mxu1  ;;  %v932_v52 = vmax.f32 %v836_v45, 0.0 }
 0x1dc   : > { %v831_v51 = vadd.f32 %v1577_v15, %v830_v50  ;;  %v930_v54 = vmax.f32 %v828_v47, 0.0 }
 0x1dd   : > { %v933_v53 = vmax.f32 %v839_v49, 0.0 }
 0x1de   : > { %v931_v55 = vmax.f32 %v831_v51, 0.0 }
 0x1df   : > { %v1599_v56 = vpack.c.bf16 %v933_v53, %v932_v52 }
 0x1e0   : > { %v1601_v57 = vpack.c.bf16 %v931_v55, %v930_v54  ;;  %v1331_v58 = vpop.f32.mrb[12].mxu1 }
 0x1e1   : > { %v852_v59 = vadd.f32 %v1331_v58, %v1577_v15  ;;  %v843_v60 = vpop.f32.mrb[13].mxu1 }
 0x1e2   : > { %v844_v61 = vadd.f32 %v1577_v15, %v843_v60  ;;  %v1332_v62 = vpop.f32.mrb[14].mxu1 }
 0x1e3   : > { %v855_v63 = vadd.f32 %v1332_v62, %v1577_v15  ;;  %v846_v0 = vpop.f32.mrb[15].mxu1  ;;  %v936_v2 = vmax.f32 %v852_v59, 0.0 }
 0x1e4   : > { %v847_v1 = vadd.f32 %v1577_v15, %v846_v0  ;;  %v934_v4 = vmax.f32 %v844_v61, 0.0  ;;  %v984_v61 = vsel %vm973_vm1, %v1593_v43, 0  ;;  %v987_v43 = vsel %vm973_vm1, %v1591_v42, 0 }
 0x1e5   : > { %v937_v3 = vmax.f32 %v855_v63, 0.0 }
 0x1e6   : > { %v935_v5 = vmax.f32 %v847_v1, 0.0 }
 0x1e7   : > { %v1607_v6 = vpack.c.bf16 %v937_v3, %v936_v2 }
 0x1e8   : > { %v1609_v7 = vpack.c.bf16 %v935_v5, %v934_v4  ;;  %v1335_v8 = vpop.f32.mrb[16].mxu1 }
 0x1e9   : > { %v868_v9 = vadd.f32 %v1335_v8, %v1577_v15  ;;  %v859_v10 = vpop.f32.mrb[17].mxu1 }
 0x1ea   : > { %v860_v11 = vadd.f32 %v1577_v15, %v859_v10  ;;  %v1336_v12 = vpop.f32.mrb[18].mxu1  ;;  %v996_v42 = vsel %vm973_vm1, %v1609_v7, 0 }
 0x1eb   : > { %v871_v13 = vadd.f32 %v1336_v12, %v1577_v15  ;;  %v862_v28 = vpop.f32.mrb[19].mxu1  ;;  %v940_v17 = vmax.f32 %v868_v9, 0.0  ;;  %v1402_v12 = vmov 1966171168  }
 0x1ec   : > { %v863_v16 = vadd.f32 %v1577_v15, %v862_v28  ;;  %v938_v19 = vmax.f32 %v860_v11, 0.0  ;;  %v990_v11 = vsel %vm973_vm1, %v1601_v57, 0  ;;  %v999_v57 = vsel %vm973_vm1, %v1607_v6, 0 }
 0x1ed   : > { %v941_v18 = vmax.f32 %v871_v13, 0.0  ;;  %v1072_v13 = vlaneseq  ;;  %v972_v28 = vstv %s971_s17 }
 0x1ee   : > { %v939_v20 = vmax.f32 %v863_v16, 0.0 }
 0x1ef   : > { %v964_v21 = vpack.c.bf16 %v941_v18, %v940_v17  ;;  %v1073_v17 = vshrl.u32 %v1072_v13, 7  ;;  %vm1086_vm2 = vcmp.lt.s32.totalorder %v1072_v13, 256 }
 0x1f0   : > { %v963_v22 = vpack.c.bf16 %v939_v20, %v938_v19  ;;  %v1339_v23 = vpop.f32.mrb[20].mxu1 }
 0x1f1   : > { %v884_v24 = vadd.f32 %v1339_v23, %v1577_v15  ;;  %v875_v25 = vpop.f32.mrb[21].mxu1 }
 0x1f2   : > { %v876_v26 = vadd.f32 %v1577_v15, %v875_v25  ;;  %1349 = vmatprep.subr.msk.bf16.mxu0 %vm973_vm1, %v963_v22  ;;  %v1340_v30 = vpop.f32.mrb[22].mxu1 }
 0x1f3   : > { %v944_v32 = vmax.f32 %v884_v24, 0.0  ;;  %v887_v33 = vadd.f32 %v1340_v30, %v1577_v15  ;;  %1244 = vmatpush3.bf16.xpose.msra.mxu0 %v978_v31  ;;  %v878_v34 = vpop.f32.mrb[23].mxu1 }
 0x1f4   : > { %v942_v35 = vmax.f32 %v876_v26, 0.0  ;;  %v879_v36 = vadd.f32 %v1577_v15, %v878_v34  ;;  %1350 = vmatprep.subr.msk.bf16.mxu0 %vm973_vm1, %v964_v21 }
 0x1f5   : > { %v945_v37 = vmax.f32 %v887_v33, 0.0 }
 0x1f6   : > { %v943_v38 = vmax.f32 %v879_v36, 0.0 }
 0x1f7   : > { %v966_v39 = vpack.c.bf16 %v945_v37, %v944_v32 }
 0x1f8   : > { %v965_v40 = vpack.c.bf16 %v943_v38, %v942_v35  ;;  %v1343_v41 = vpop.f32.mrb[24].mxu1 }
 0x1f9   : > { %v900_v44 = vadd.f32 %v1343_v41, %v1577_v15  ;;  %v891_v45 = vpop.f32.mrb[25].mxu1 }
 0x1fa   : > { %v892_v46 = vadd.f32 %v1577_v15, %v891_v45  ;;  %v1344_v47 = vpop.f32.mrb[26].mxu1 }
 0x1fb   : > { %1246 = vmatpush3.bf16.xpose.msra.mxu0 %v981_v29  ;;  %v948_v48 = vmax.f32 %v900_v44, 0.0  ;;  %v903_v49 = vadd.f32 %v1344_v47, %v1577_v15  ;;  %v894_v50 = vpop.f32.mrb[27].mxu1 }
 0x1fc   : > { %1351 = vmatprep.subr.msk.bf16.mxu0 %vm973_vm1, %v965_v40  ;;  %v946_v51 = vmax.f32 %v892_v46, 0.0  ;;  %v895_v52 = vadd.f32 %v1577_v15, %v894_v50 }
 0x1fd   : > { %v949_v53 = vmax.f32 %v903_v49, 0.0 }
 0x1fe   : > { %v947_v54 = vmax.f32 %v895_v52, 0.0 }
 0x1ff   : > { %v968_v55 = vpack.c.bf16 %v949_v53, %v948_v48 }
 0x200   : > { %v967_v58 = vpack.c.bf16 %v947_v54, %v946_v51  ;;  %v1347_v59 = vpop.f32.mrb[28].mxu1 }
 0x201   : > { %v916_v27 = vadd.f32 %v1347_v59, %v1577_v15  ;;  %v907_v60 = vpop.f32.mrb[29].mxu1 }
 0x202   : > { %v908_v62 = vadd.f32 %v1577_v15, %v907_v60  ;;  %v1348_v63 = vpop.f32.mrb[30].mxu1 }
 0x203   : > { %1248 = vmatpush3.bf16.xpose.msra.mxu0 %v984_v61  ;;  %v952_v0 = vmax.f32 %v916_v27, 0.0  ;;  %v919_v1 = vadd.f32 %v1348_v63, %v1577_v15  ;;  %v910_v2 = vpop.f32.mrb[31].mxu1 }
 0x204   : > { %1352 = vmatprep.subr.msk.bf16.mxu0 %vm973_vm1, %v966_v39  ;;  %v950_v3 = vmax.f32 %v908_v62, 0.0  ;;  %v911_v4 = vadd.f32 %v1577_v15, %v910_v2  ;;  %v993_v15 = vsel %vm973_vm1, %v1599_v56, 0  ;;  %v1070_v56 = vunpack.c.l.s4 %v1402_v12 }
 0x205   : > { %v953_v5 = vmax.f32 %v919_v1, 0.0 }
 0x206   : > { %v951_v8 = vmax.f32 %v911_v4, 0.0  ;;  %v1071_v16 = vunpack.c.0.s8 %v1070_v56 }
 0x207   : > { %v970_v9 = vpack.c.bf16 %v953_v5, %v952_v0 }
 0x208   : > { %v969_v10 = vpack.c.bf16 %v951_v8, %v950_v3  ;;  %v1074_v21 = vsub.s32 %v1071_v16, %v1073_v17 }
 0x20b   : > { %1250 = vmatpush3.bf16.xpose.msra.mxu0 %v987_v43 }
 0x20c   : > { %1353 = vmatprep.subr.msk.bf16.mxu0 %vm973_vm1, %v967_v58 }
 0x213   : > { %1252 = vmatpush3.bf16.xpose.msra.mxu0 %v990_v11 }
 0x214   : > { %1354 = vmatprep.subr.msk.bf16.mxu0 %vm973_vm1, %v968_v55 }
 0x21b   : > { %1254 = vmatpush3.bf16.xpose.msra.mxu0 %v993_v15 }
 0x21c   : > { %1355 = vmatprep.subr.msk.bf16.mxu0 %vm973_vm1, %v969_v10 }
 0x223   : > { %1256 = vmatpush3.bf16.xpose.msra.mxu0 %v996_v42 }
 0x224   : > { %1356 = vmatprep.subr.msk.bf16.mxu0 %vm973_vm1, %v970_v9 }
 0x22b   : > { %1258 = vmatpush3.bf16.xpose.msra.mxu0 %v999_v57 }
 0x232   : > { %1260 = vmatmul.mubr.msk.bf16.vlgmr.msra.gmra.mrb[32].mxu0 %vm973_vm1, %v1570_v14 }
 0x305   : > { %v1059_v18 = vpop.f32.mrb[32].mxu0 }
 0x306   : > { %v1060_v7 = vadd.f32 %v1059_v18, %v972_v28  ;;  %v1061_v19 = vpop.f32.mrb[33].mxu0 }
 0x307   : > { %v1062_v20 = vadd.f32 %v1061_v19, %v972_v28  ;;  %v1063_v22 = vpop.f32.mrb[34].mxu0 }
 0x308   : > { %v1064_v6 = vpop.f32.mrb[35].mxu0 }
 0x309   : > { %v1068_v23 = vcombine.low %v1060_v7, %v1062_v20 }
 0x30b   : > { %v1075_v24 = vrot.slane %v1068_v23, %v1074_v21 }
 0x30d   : > { %v1082_v14 = vrot.slane %v1075_v24, %v1074_v21 }
 0x30f   : > { %1088 = vst.msk [vmem:[%s279_s21] sm:$0x3] %vm1086_vm2, %v1082_v14 }
 0x310 PF: > { %s18_s26 = sadd.s32 1, %s1400_s26  }
 0x311   : > { %p15_p5 = scmp.ge.s32.totalorder %s18_s26, 4  }
 0x313   :  { %17 = sbr.rel (!%p15_p5) target bundleno = 2 (0x2), region = 78 }

</bundles_post_ra>
